<compile_context>
chip_gen: v6e
topology: v6e:2x2x1
jax: 0.10.0
libtpu: 0.0.40
codegen_flags: <defaults>
</compile_context>

<pallas_src>
import functools
import math

import jax
import jax.numpy as jnp
from jax.experimental import pallas as pl
from jax.experimental.pallas import tpu as pltpu

NUM_HEADS = 4
P_HI = jax.lax.Precision.HIGHEST


def transformer_layer_kernel(hV_ref, hE_ref, mA_ref, mV_ref,
                             wqT_ref, wkvT_ref, s_ref, st_ref, woT_ref,
                             winT_ref, bin_ref, woutT_ref, bout_ref,
                             g0_ref, b0_ref, g1_ref, b1_ref,
                             out_ref, *, num_heads):
    hV = hV_ref[...].astype(jnp.float32)          # [TM, H]
    mA = mA_ref[...].astype(jnp.float32)          # [K, TM, 1]
    mV = mV_ref[...].astype(jnp.float32)          # [TM, 1]

    TM, H = hV.shape
    K, _, NI = hE_ref.shape
    neg_inf = float(jnp.finfo(jnp.float32).min)

    # ---- attention projections (K and V fused into one MXU matmul) ----
    Q = jnp.dot(hV, wqT_ref[...], preferred_element_type=jnp.float32)        # [TM, H]

    hE = hE_ref[...].astype(jnp.float32).reshape(K * TM, NI)                 # [K*TM, NI]
    KV = jnp.dot(hE, wkvT_ref[...], preferred_element_type=jnp.float32)      # [K*TM, 2H]
    KV = KV.reshape(K, TM, 2 * H)
    Kp = KV[:, :, :H]                                                        # [K, TM, H]
    Vp = KV[:, :, H:]                                                        # [K, TM, H]

    # ---- per-head logits via block-diagonal head-sum matrix (1/sqrt(D) folded into s_ref) ----
    QK = Q[None, :, :] * Kp                                                  # [K, TM, H]
    logits = jnp.dot(QK.reshape(K * TM, H), s_ref[...],
                     preferred_element_type=jnp.float32).reshape(K, TM, num_heads)
    logits = jnp.where(mA > 0.0, logits, neg_inf)                            # [K, TM, NH]

    # ---- numerically stable masked softmax over the K neighbors (axis 0), exact division ----
    lmax = jnp.max(logits, axis=0, keepdims=True)                            # [1, TM, NH]
    exps = jnp.exp(logits - lmax)                                            # [K, TM, NH]
    denom = jnp.sum(exps, axis=0, keepdims=True)                             # [1, TM, NH]
    attend = mA * exps * (1.0 / denom)                                       # [K, TM, NH]

    # ---- broadcast heads back to H lanes, accumulate values, apply W_O (one matmul) ----
    attend_full = jnp.dot(attend.reshape(K * TM, num_heads), st_ref[...],
                          preferred_element_type=jnp.float32).reshape(K, TM, H)
    weighted = jnp.sum(attend_full * Vp, axis=0)                             # [TM, H]
    dh = jnp.dot(weighted, woT_ref[...], preferred_element_type=jnp.float32) # [TM, H]

    # ---- Normalize (torch.var is unbiased -> divide by H-1; (sigma+eps) denominator) ----
    def normalize(x, gain, bias, eps=1e-6):
        mu = jnp.mean(x, axis=-1, keepdims=True)
        var = jnp.sum((x - mu) ** 2, axis=-1, keepdims=True) / (x.shape[-1] - 1)
        sigma = jnp.sqrt(var + eps)
        return gain * (x - mu) / (sigma + eps) + bias

    x = normalize(hV + dh, g0_ref[...], b0_ref[...])                         # [TM, H]

    # ---- position-wise feed-forward ----
    hff = jnp.maximum(
        jnp.dot(x, winT_ref[...], preferred_element_type=jnp.float32) + bin_ref[...],
        0.0)                                                                 # [TM, 4H]
    dh2 = jnp.dot(hff, woutT_ref[...],
                  preferred_element_type=jnp.float32) + bout_ref[...]        # [TM, H]

    y = normalize(x + dh2, g1_ref[...], b1_ref[...])
    out_ref[...] = (mV * y).astype(out_ref.dtype)


def _round_up(a, b):
    return (a + b - 1) // b * b


def transformer_layer(h_V, h_E, mask_V, mask_attend, params,
                      num_heads=NUM_HEADS, tm=256):
    B, N, H = h_V.shape
    K, NI = h_E.shape[2], h_E.shape[3]
    D = H // num_heads
    M = B * N

    # Effective tile: multiple of 8, no bigger than the (padded) problem.
    tm = max(8, (min(tm, _round_up(M, 8)) // 8) * 8)
    M_pad = _round_up(M, tm)

    hVf = h_V.reshape(M, H)
    hEk = jnp.transpose(h_E.reshape(M, K, NI), (1, 0, 2))                    # [K, M, NI]
    mAk = jnp.transpose(mask_attend.reshape(M, K), (1, 0))[:, :, None]       # [K, M, 1]
    mVf = mask_V.reshape(M, 1)

    if M_pad != M:
        pad = M_pad - M   # zero padding is safe: padded rows are fully masked
        hVf = jnp.pad(hVf, ((0, pad), (0, 0)))
        hEk = jnp.pad(hEk, ((0, 0), (0, pad), (0, 0)))
        mAk = jnp.pad(mAk, ((0, 0), (0, pad), (0, 0)))
        mVf = jnp.pad(mVf, ((0, pad), (0, 0)))

    (wq, wk, wv, wo, win, b_in, wout, b_out, g0, b0, g1, b1) = params
    wqT = wq.T
    wkvT = jnp.concatenate([wk.T, wv.T], axis=1)                             # [NI, 2H]
    woT = wo.T
    winT, woutT = win.T, wout.T
    bin2, bout2 = b_in.reshape(1, -1), b_out.reshape(1, -1)
    g02, b02 = g0.reshape(1, -1), b0.reshape(1, -1)
    g12, b12 = g1.reshape(1, -1), b1.reshape(1, -1)

    # Block-diagonal head-sum matrix: head_sum[j, h] = 1 iff j // D == h.
    head_sum = jnp.repeat(jnp.eye(num_heads, dtype=jnp.float32), D, axis=0)  # [H, NH]
    s_scaled = head_sum * (1.0 / math.sqrt(D))                               # scale folded in
    head_bcast = head_sum.T                                                  # [NH, H]

    def full_spec(a):
        n = a.ndim
        return pl.BlockSpec(a.shape, lambda i, _n=n: (0,) * _n)

    in_specs = [
        pl.BlockSpec((tm, H), lambda i: (i, 0)),          # h_V tile
        pl.BlockSpec((K, tm, NI), lambda i: (0, i, 0)),   # h_E tile (k-major)
        pl.BlockSpec((K, tm, 1), lambda i: (0, i, 0)),    # mask_attend tile (k-major)
        pl.BlockSpec((tm, 1), lambda i: (i, 0)),          # mask_V tile
        full_spec(wqT), full_spec(wkvT), full_spec(s_scaled), full_spec(head_bcast),
        full_spec(woT), full_spec(winT), full_spec(bin2), full_spec(woutT),
        full_spec(bout2), full_spec(g02), full_spec(b02), full_spec(g12), full_spec(b12),
    ]

    out = pl.pallas_call(
        functools.partial(transformer_layer_kernel, num_heads=num_heads),
        out_shape=jax.ShapeDtypeStruct((M_pad, H), h_V.dtype),
        grid=(M_pad // tm,),
        in_specs=in_specs,
        out_specs=pl.BlockSpec((tm, H), lambda i: (i, 0)),
        compiler_params=pltpu.CompilerParams(dimension_semantics=("parallel",)),
    )(hVf, hEk, mAk, mVf,
      wqT, wkvT, s_scaled, head_bcast, woT,
      winT, bin2, woutT, bout2,
      g02, b02, g12, b12)

    return out[:M].reshape(B, N, H)


def transformer_layer_reference(h_V, h_E, mask_V, mask_attend, params,
                                num_heads=NUM_HEADS):
    """Plain-JAX mirror of the PyTorch forward pass (eval-mode dropout).

    All matmuls use Precision.HIGHEST so the f32 reference is accurate on TPU
    (XLA's DEFAULT matmul precision truncates f32 inputs)."""
    (wq, wk, wv, wo, win, b_in, wout, b_out, g0, b0, g1, b1) = params
    B, N, H = h_V.shape
    K = h_E.shape[2]
    D = H // num_heads
    neg_inf = float(jnp.finfo(jnp.float32).min)

    Q = jnp.dot(h_V, wq.T, precision=P_HI).reshape(B, N, 1, num_heads, 1, D)
    Kt = jnp.dot(h_E, wk.T, precision=P_HI).reshape(B, N, K, num_heads, D, 1)
    V = jnp.dot(h_E, wv.T, precision=P_HI).reshape(B, N, K, num_heads, D)
    logits = jnp.matmul(Q, Kt, precision=P_HI).reshape(B, N, K, num_heads)
    logits = jnp.transpose(logits, (0, 1, 3, 2)) / math.sqrt(D)        # [B,N,heads,K]
    mask = mask_attend[:, :, None, :]
    logits = jnp.where(mask > 0, logits, neg_inf)
    attend = jax.nn.softmax(logits, axis=-1)
    attend = mask * attend
    upd = jnp.matmul(attend[..., None, :],
                     jnp.transpose(V, (0, 1, 3, 2, 4)),
                     precision=P_HI)                                   # [B,N,heads,1,D]
    dh = jnp.dot(upd.reshape(B, N, H), wo.T, precision=P_HI)

    def normalize(x, gain, bias, eps=1e-6):
        mu = jnp.mean(x, axis=-1, keepdims=True)
        var = jnp.sum((x - mu) ** 2, axis=-1, keepdims=True) / (x.shape[-1] - 1)
        return gain * (x - mu) / (jnp.sqrt(var + eps) + eps) + bias

    x = normalize(h_V + dh, g0, b0)
    hff = jax.nn.relu(jnp.dot(x, win.T, precision=P_HI) + b_in)
    dh2 = jnp.dot(hff, wout.T, precision=P_HI) + b_out
    y = normalize(x + dh2, g1, b1)
    return mask_V[..., None] * y


if __name__ == "__main__":
    B, N, K = 2, 8, 4
    H = 32               # num_hidden
    NI = 2 * H           # num_in (edge features)
    FF = 4 * H

    key = jax.random.PRNGKey(0)
    ks = jax.random.split(key, 12)

    params = (
        jax.random.normal(ks[0], (H, H), jnp.float32) * 0.1,    # W_Q
        jax.random.normal(ks[1], (H, NI), jnp.float32) * 0.1,   # W_K
        jax.random.normal(ks[2], (H, NI), jnp.float32) * 0.1,   # W_V
        jax.random.normal(ks[3], (H, H), jnp.float32) * 0.1,    # W_O
        jax.random.normal(ks[4], (FF, H), jnp.float32) * 0.1,   # W_in
        jax.random.normal(ks[5], (FF,), jnp.float32) * 0.1,     # b_in
        jax.random.normal(ks[6], (H, FF), jnp.float32) * 0.1,   # W_out
        jax.random.normal(ks[7], (H,), jnp.float32) * 0.1,      # b_out
        jnp.ones((H,), jnp.float32),                            # norm0 gain
        jnp.zeros((H,), jnp.float32),                           # norm0 bias
        jnp.ones((H,), jnp.float32),                            # norm1 gain
        jnp.zeros((H,), jnp.float32),                           # norm1 bias
    )

    h_V = jax.random.normal(ks[8], (B, N, H), jnp.float32)
    h_E = jax.random.normal(ks[9], (B, N, K, NI), jnp.float32)
    mask_attend = (jax.random.uniform(ks[10], (B, N, K)) > 0.3).astype(jnp.float32)
    mask_V = (jax.random.uniform(ks[11], (B, N)) > 0.2).astype(jnp.float32)

    out = transformer_layer(h_V, h_E, mask_V, mask_attend, params)
    out = jax.block_until_ready(out)

    ref = transformer_layer_reference(h_V, h_E, mask_V, mask_attend, params)
    assert out.shape == (B, N, H)
    max_err = float(jnp.max(jnp.abs(out - ref)))
    assert bool(jnp.allclose(out, ref, rtol=5e-3, atol=5e-3)), (
        f"mismatch vs reference (max abs err {max_err:.3e})")

    print("KERNEL_OK")
</pallas_src>

<mosaic_0001>
module attributes {stable_mosaic.version = 11 : i64} {
  func.func @transformer_layer_kernel(%arg0: i32, %arg1: memref<16x32xf32, #tpu.memory_space<vmem>>, %arg2: memref<4x16x64xf32, #tpu.memory_space<vmem>>, %arg3: memref<4x16x1xf32, #tpu.memory_space<vmem>>, %arg4: memref<16x1xf32, #tpu.memory_space<vmem>>, %arg5: memref<32x32xf32, #tpu.memory_space<vmem>>, %arg6: memref<64x64xf32, #tpu.memory_space<vmem>>, %arg7: memref<32x4xf32, #tpu.memory_space<vmem>>, %arg8: memref<4x32xf32, #tpu.memory_space<vmem>>, %arg9: memref<32x32xf32, #tpu.memory_space<vmem>>, %arg10: memref<32x128xf32, #tpu.memory_space<vmem>>, %arg11: memref<1x128xf32, #tpu.memory_space<vmem>>, %arg12: memref<128x32xf32, #tpu.memory_space<vmem>>, %arg13: memref<1x32xf32, #tpu.memory_space<vmem>>, %arg14: memref<1x32xf32, #tpu.memory_space<vmem>>, %arg15: memref<1x32xf32, #tpu.memory_space<vmem>>, %arg16: memref<1x32xf32, #tpu.memory_space<vmem>>, %arg17: memref<1x32xf32, #tpu.memory_space<vmem>>, %arg18: memref<16x32xf32, #tpu.memory_space<vmem>>) attributes {dimension_semantics = [#tpu.dimension_semantics<parallel>], iteration_bounds = array<i64: 1>, scalar_prefetch = 0 : i64, scratch_operands = 0 : i64, tpu.core_type = #tpu.core_type<tc>, window_params = [{transform_indices = @transform_0, window_bounds = array<i64: 16, 32>}, {transform_indices = @transform_1, window_bounds = array<i64: 4, 16, 64>}, {transform_indices = @transform_2, window_bounds = array<i64: 4, 16, 1>}, {transform_indices = @transform_3, window_bounds = array<i64: 16, 1>}, {pipeline_mode = #tpu.pipeline_mode<synchronous>, transform_indices = @transform_4, window_bounds = array<i64: 32, 32>}, {pipeline_mode = #tpu.pipeline_mode<synchronous>, transform_indices = @transform_5, window_bounds = array<i64: 64, 64>}, {pipeline_mode = #tpu.pipeline_mode<synchronous>, transform_indices = @transform_6, window_bounds = array<i64: 32, 4>}, {pipeline_mode = #tpu.pipeline_mode<synchronous>, transform_indices = @transform_7, window_bounds = array<i64: 4, 32>}, {pipeline_mode = #tpu.pipeline_mode<synchronous>, transform_indices = @transform_8, window_bounds = array<i64: 32, 32>}, {pipeline_mode = #tpu.pipeline_mode<synchronous>, transform_indices = @transform_9, window_bounds = array<i64: 32, 128>}, {pipeline_mode = #tpu.pipeline_mode<synchronous>, transform_indices = @transform_10, window_bounds = array<i64: 1, 128>}, {pipeline_mode = #tpu.pipeline_mode<synchronous>, transform_indices = @transform_11, window_bounds = array<i64: 128, 32>}, {pipeline_mode = #tpu.pipeline_mode<synchronous>, transform_indices = @transform_12, window_bounds = array<i64: 1, 32>}, {pipeline_mode = #tpu.pipeline_mode<synchronous>, transform_indices = @transform_13, window_bounds = array<i64: 1, 32>}, {pipeline_mode = #tpu.pipeline_mode<synchronous>, transform_indices = @transform_14, window_bounds = array<i64: 1, 32>}, {pipeline_mode = #tpu.pipeline_mode<synchronous>, transform_indices = @transform_15, window_bounds = array<i64: 1, 32>}, {pipeline_mode = #tpu.pipeline_mode<synchronous>, transform_indices = @transform_16, window_bounds = array<i64: 1, 32>}, {transform_indices = @transform_17, window_bounds = array<i64: 16, 32>}]} {
    %c0 = arith.constant 0 : index
    %c0_0 = arith.constant 0 : index
    %0 = vector.load %arg1[%c0, %c0_0] : memref<16x32xf32, #tpu.memory_space<vmem>>, vector<16x32xf32>
    %c0_1 = arith.constant 0 : index
    %c0_2 = arith.constant 0 : index
    %c0_3 = arith.constant 0 : index
    %1 = vector.load %arg3[%c0_1, %c0_2, %c0_3] : memref<4x16x1xf32, #tpu.memory_space<vmem>>, vector<4x16x1xf32>
    %c0_4 = arith.constant 0 : index
    %c0_5 = arith.constant 0 : index
    %2 = vector.load %arg4[%c0_4, %c0_5] : memref<16x1xf32, #tpu.memory_space<vmem>>, vector<16x1xf32>
    %c0_6 = arith.constant 0 : index
    %c0_7 = arith.constant 0 : index
    %3 = vector.load %arg5[%c0_6, %c0_7] : memref<32x32xf32, #tpu.memory_space<vmem>>, vector<32x32xf32>
    %cst = arith.constant dense<0.000000e+00> : vector<16x32xf32>
    %4 = tpu.matmul %0, %3, %cst {dimension_numbers = #tpu.dot_dimension_numbers<[1], [0], [0], [1], [0, 0, 1, 1], [], []>} : vector<16x32xf32>, vector<32x32xf32>, vector<16x32xf32> -> vector<16x32xf32>
    %c0_8 = arith.constant 0 : index
    %c0_9 = arith.constant 0 : index
    %c0_10 = arith.constant 0 : index
    %5 = vector.load %arg2[%c0_8, %c0_9, %c0_10] : memref<4x16x64xf32, #tpu.memory_space<vmem>>, vector<4x16x64xf32>
    %6 = vector.shape_cast %5 : vector<4x16x64xf32> to vector<64x64xf32>
    %c0_11 = arith.constant 0 : index
    %c0_12 = arith.constant 0 : index
    %7 = vector.load %arg6[%c0_11, %c0_12] : memref<64x64xf32, #tpu.memory_space<vmem>>, vector<64x64xf32>
    %cst_13 = arith.constant dense<0.000000e+00> : vector<64x64xf32>
    %8 = tpu.matmul %6, %7, %cst_13 {dimension_numbers = #tpu.dot_dimension_numbers<[1], [0], [0], [1], [0, 0, 1, 1], [], []>} : vector<64x64xf32>, vector<64x64xf32>, vector<64x64xf32> -> vector<64x64xf32>
    %9 = vector.shape_cast %8 : vector<64x64xf32> to vector<4x16x64xf32>
    %10 = vector.extract_strided_slice %9 {offsets = [0, 0, 0], sizes = [4, 16, 32], strides = [1, 1, 1]} : vector<4x16x64xf32> to vector<4x16x32xf32>
    %11 = vector.extract_strided_slice %9 {offsets = [0, 0, 32], sizes = [4, 16, 32], strides = [1, 1, 1]} : vector<4x16x64xf32> to vector<4x16x32xf32>
    %12 = vector.shape_cast %4 : vector<16x32xf32> to vector<1x16x32xf32>
    %13 = vector.broadcast %12 : vector<1x16x32xf32> to vector<4x16x32xf32>
    %14 = arith.mulf %13, %10 : vector<4x16x32xf32>
    %15 = vector.shape_cast %14 : vector<4x16x32xf32> to vector<64x32xf32>
    %c0_14 = arith.constant 0 : index
    %c0_15 = arith.constant 0 : index
    %16 = vector.load %arg7[%c0_14, %c0_15] : memref<32x4xf32, #tpu.memory_space<vmem>>, vector<32x4xf32>
    %cst_16 = arith.constant dense<0.000000e+00> : vector<64x4xf32>
    %17 = tpu.matmul %15, %16, %cst_16 {dimension_numbers = #tpu.dot_dimension_numbers<[1], [0], [0], [1], [0, 0, 1, 1], [], []>} : vector<64x32xf32>, vector<32x4xf32>, vector<64x4xf32> -> vector<64x4xf32>
    %18 = vector.shape_cast %17 : vector<64x4xf32> to vector<4x16x4xf32>
    %cst_17 = arith.constant 0.000000e+00 : f32
    %19 = vector.broadcast %cst_17 : f32 to vector<4x16x1xf32>
    %20 = arith.cmpf ogt, %1, %19 : vector<4x16x1xf32>
    %cst_18 = arith.constant -3.40282347E+38 : f32
    %21 = vector.shape_cast %20 : vector<4x16x1xi1> to vector<4x16x1xi1>
    %22 = vector.broadcast %21 : vector<4x16x1xi1> to vector<4x16x4xi1>
    %23 = vector.broadcast %cst_18 : f32 to vector<4x16x4xf32>
    %24 = arith.select %22, %18, %23 : vector<4x16x4xi1>, vector<4x16x4xf32>
    %cst_19 = arith.constant dense<0xFF800000> : vector<16x4xf32>
    %25 = vector.multi_reduction <maximumf>, %24, %cst_19 [0] : vector<4x16x4xf32> to vector<16x4xf32>
    %26 = vector.shape_cast %25 : vector<16x4xf32> to vector<1x16x4xf32>
    %27 = vector.broadcast %26 : vector<1x16x4xf32> to vector<4x16x4xf32>
    %28 = arith.subf %24, %27 : vector<4x16x4xf32>
    %29 = math.exp %28 : vector<4x16x4xf32>
    %cst_20 = arith.constant dense<0.000000e+00> : vector<16x4xf32>
    %30 = vector.multi_reduction <add>, %29, %cst_20 [0] : vector<4x16x4xf32> to vector<16x4xf32>
    %31 = vector.shape_cast %30 : vector<16x4xf32> to vector<1x16x4xf32>
    %32 = vector.broadcast %1 : vector<4x16x1xf32> to vector<4x16x4xf32>
    %33 = arith.mulf %32, %29 : vector<4x16x4xf32>
    %cst_21 = arith.constant 1.000000e+00 : f32
    %34 = vector.broadcast %cst_21 : f32 to vector<1x16x4xf32>
    %35 = arith.divf %34, %31 : vector<1x16x4xf32>
    %36 = vector.broadcast %35 : vector<1x16x4xf32> to vector<4x16x4xf32>
    %37 = arith.mulf %33, %36 : vector<4x16x4xf32>
    %38 = vector.shape_cast %37 : vector<4x16x4xf32> to vector<64x4xf32>
    %c0_22 = arith.constant 0 : index
    %c0_23 = arith.constant 0 : index
    %39 = vector.load %arg8[%c0_22, %c0_23] : memref<4x32xf32, #tpu.memory_space<vmem>>, vector<4x32xf32>
    %cst_24 = arith.constant dense<0.000000e+00> : vector<64x32xf32>
    %40 = tpu.matmul %38, %39, %cst_24 {dimension_numbers = #tpu.dot_dimension_numbers<[1], [0], [0], [1], [0, 0, 1, 1], [], []>} : vector<64x4xf32>, vector<4x32xf32>, vector<64x32xf32> -> vector<64x32xf32>
    %41 = vector.shape_cast %40 : vector<64x32xf32> to vector<4x16x32xf32>
    %42 = arith.mulf %41, %11 : vector<4x16x32xf32>
    %cst_25 = arith.constant dense<0.000000e+00> : vector<16x32xf32>
    %43 = vector.multi_reduction <add>, %42, %cst_25 [0] : vector<4x16x32xf32> to vector<16x32xf32>
    %c0_26 = arith.constant 0 : index
    %c0_27 = arith.constant 0 : index
    %44 = vector.load %arg9[%c0_26, %c0_27] : memref<32x32xf32, #tpu.memory_space<vmem>>, vector<32x32xf32>
    %cst_28 = arith.constant dense<0.000000e+00> : vector<16x32xf32>
    %45 = tpu.matmul %43, %44, %cst_28 {dimension_numbers = #tpu.dot_dimension_numbers<[1], [0], [0], [1], [0, 0, 1, 1], [], []>} : vector<16x32xf32>, vector<32x32xf32>, vector<16x32xf32> -> vector<16x32xf32>
    %46 = arith.addf %0, %45 : vector<16x32xf32>
    %c0_29 = arith.constant 0 : index
    %c0_30 = arith.constant 0 : index
    %47 = vector.load %arg14[%c0_29, %c0_30] : memref<1x32xf32, #tpu.memory_space<vmem>>, vector<1x32xf32>
    %c0_31 = arith.constant 0 : index
    %c0_32 = arith.constant 0 : index
    %48 = vector.load %arg15[%c0_31, %c0_32] : memref<1x32xf32, #tpu.memory_space<vmem>>, vector<1x32xf32>
    %cst_33 = arith.constant dense<0.000000e+00> : vector<16xf32>
    %49 = vector.multi_reduction <add>, %46, %cst_33 [1] : vector<16x32xf32> to vector<16xf32>
    %50 = vector.shape_cast %49 : vector<16xf32> to vector<16x1xf32>
    %cst_34 = arith.constant 3.200000e+01 : f32
    %51 = vector.broadcast %cst_34 : f32 to vector<16x1xf32>
    %52 = arith.divf %50, %51 : vector<16x1xf32>
    %53 = vector.broadcast %52 : vector<16x1xf32> to vector<16x32xf32>
    %54 = arith.subf %46, %53 : vector<16x32xf32>
    %55 = arith.mulf %54, %54 : vector<16x32xf32>
    %cst_35 = arith.constant dense<0.000000e+00> : vector<16xf32>
    %56 = vector.multi_reduction <add>, %55, %cst_35 [1] : vector<16x32xf32> to vector<16xf32>
    %57 = vector.shape_cast %56 : vector<16xf32> to vector<16x1xf32>
    %cst_36 = arith.constant 3.100000e+01 : f32
    %58 = vector.broadcast %cst_36 : f32 to vector<16x1xf32>
    %59 = arith.divf %57, %58 : vector<16x1xf32>
    %cst_37 = arith.constant 9.99999997E-7 : f32
    %60 = vector.broadcast %cst_37 : f32 to vector<16x1xf32>
    %61 = arith.addf %59, %60 : vector<16x1xf32>
    %62 = math.sqrt %61 : vector<16x1xf32>
    %63 = vector.broadcast %52 : vector<16x1xf32> to vector<16x32xf32>
    %64 = arith.subf %46, %63 : vector<16x32xf32>
    %65 = vector.broadcast %47 : vector<1x32xf32> to vector<16x32xf32>
    %66 = arith.mulf %65, %64 : vector<16x32xf32>
    %cst_38 = arith.constant 9.99999997E-7 : f32
    %67 = vector.broadcast %cst_38 : f32 to vector<16x1xf32>
    %68 = arith.addf %62, %67 : vector<16x1xf32>
    %69 = vector.broadcast %68 : vector<16x1xf32> to vector<16x32xf32>
    %70 = arith.divf %66, %69 : vector<16x32xf32>
    %71 = vector.broadcast %48 : vector<1x32xf32> to vector<16x32xf32>
    %72 = arith.addf %70, %71 : vector<16x32xf32>
    %c0_39 = arith.constant 0 : index
    %c0_40 = arith.constant 0 : index
    %73 = vector.load %arg10[%c0_39, %c0_40] : memref<32x128xf32, #tpu.memory_space<vmem>>, vector<32x128xf32>
    %cst_41 = arith.constant dense<0.000000e+00> : vector<16x128xf32>
    %74 = tpu.matmul %72, %73, %cst_41 {dimension_numbers = #tpu.dot_dimension_numbers<[1], [0], [0], [1], [0, 0, 1, 1], [], []>} : vector<16x32xf32>, vector<32x128xf32>, vector<16x128xf32> -> vector<16x128xf32>
    %c0_42 = arith.constant 0 : index
    %c0_43 = arith.constant 0 : index
    %75 = vector.load %arg11[%c0_42, %c0_43] : memref<1x128xf32, #tpu.memory_space<vmem>>, vector<1x128xf32>
    %76 = vector.broadcast %75 : vector<1x128xf32> to vector<16x128xf32>
    %77 = arith.addf %74, %76 : vector<16x128xf32>
    %cst_44 = arith.constant 0.000000e+00 : f32
    %78 = vector.broadcast %cst_44 : f32 to vector<16x128xf32>
    %79 = arith.maximumf %77, %78 : vector<16x128xf32>
    %c0_45 = arith.constant 0 : index
    %c0_46 = arith.constant 0 : index
    %80 = vector.load %arg12[%c0_45, %c0_46] : memref<128x32xf32, #tpu.memory_space<vmem>>, vector<128x32xf32>
    %cst_47 = arith.constant dense<0.000000e+00> : vector<16x32xf32>
    %81 = tpu.matmul %79, %80, %cst_47 {dimension_numbers = #tpu.dot_dimension_numbers<[1], [0], [0], [1], [0, 0, 1, 1], [], []>} : vector<16x128xf32>, vector<128x32xf32>, vector<16x32xf32> -> vector<16x32xf32>
    %c0_48 = arith.constant 0 : index
    %c0_49 = arith.constant 0 : index
    %82 = vector.load %arg13[%c0_48, %c0_49] : memref<1x32xf32, #tpu.memory_space<vmem>>, vector<1x32xf32>
    %83 = vector.broadcast %82 : vector<1x32xf32> to vector<16x32xf32>
    %84 = arith.addf %81, %83 : vector<16x32xf32>
    %85 = arith.addf %72, %84 : vector<16x32xf32>
    %c0_50 = arith.constant 0 : index
    %c0_51 = arith.constant 0 : index
    %86 = vector.load %arg16[%c0_50, %c0_51] : memref<1x32xf32, #tpu.memory_space<vmem>>, vector<1x32xf32>
    %c0_52 = arith.constant 0 : index
    %c0_53 = arith.constant 0 : index
    %87 = vector.load %arg17[%c0_52, %c0_53] : memref<1x32xf32, #tpu.memory_space<vmem>>, vector<1x32xf32>
    %cst_54 = arith.constant dense<0.000000e+00> : vector<16xf32>
    %88 = vector.multi_reduction <add>, %85, %cst_54 [1] : vector<16x32xf32> to vector<16xf32>
    %89 = vector.shape_cast %88 : vector<16xf32> to vector<16x1xf32>
    %cst_55 = arith.constant 3.200000e+01 : f32
    %90 = vector.broadcast %cst_55 : f32 to vector<16x1xf32>
    %91 = arith.divf %89, %90 : vector<16x1xf32>
    %92 = vector.broadcast %91 : vector<16x1xf32> to vector<16x32xf32>
    %93 = arith.subf %85, %92 : vector<16x32xf32>
    %94 = arith.mulf %93, %93 : vector<16x32xf32>
    %cst_56 = arith.constant dense<0.000000e+00> : vector<16xf32>
    %95 = vector.multi_reduction <add>, %94, %cst_56 [1] : vector<16x32xf32> to vector<16xf32>
    %96 = vector.shape_cast %95 : vector<16xf32> to vector<16x1xf32>
    %cst_57 = arith.constant 3.100000e+01 : f32
    %97 = vector.broadcast %cst_57 : f32 to vector<16x1xf32>
    %98 = arith.divf %96, %97 : vector<16x1xf32>
    %cst_58 = arith.constant 9.99999997E-7 : f32
    %99 = vector.broadcast %cst_58 : f32 to vector<16x1xf32>
    %100 = arith.addf %98, %99 : vector<16x1xf32>
    %101 = math.sqrt %100 : vector<16x1xf32>
    %102 = vector.broadcast %91 : vector<16x1xf32> to vector<16x32xf32>
    %103 = arith.subf %85, %102 : vector<16x32xf32>
    %104 = vector.broadcast %86 : vector<1x32xf32> to vector<16x32xf32>
    %105 = arith.mulf %104, %103 : vector<16x32xf32>
    %cst_59 = arith.constant 9.99999997E-7 : f32
    %106 = vector.broadcast %cst_59 : f32 to vector<16x1xf32>
    %107 = arith.addf %101, %106 : vector<16x1xf32>
    %108 = vector.broadcast %107 : vector<16x1xf32> to vector<16x32xf32>
    %109 = arith.divf %105, %108 : vector<16x32xf32>
    %110 = vector.broadcast %87 : vector<1x32xf32> to vector<16x32xf32>
    %111 = arith.addf %109, %110 : vector<16x32xf32>
    %112 = vector.broadcast %2 : vector<16x1xf32> to vector<16x32xf32>
    %113 = arith.mulf %112, %111 : vector<16x32xf32>
    %c0_60 = arith.constant 0 : index
    %c0_61 = arith.constant 0 : index
    %114 = vector.load %arg18[%c0_60, %c0_61] : memref<16x32xf32, #tpu.memory_space<vmem>>, vector<16x32xf32>
    tpu.vector_store %arg18[%c0_60, %c0_61], %113 {strides = array<i32>} : memref<16x32xf32, #tpu.memory_space<vmem>>, vector<16x32xf32>,
    return
  }
  func.func @transform_0(%arg0: i32) -> (i32, i32) {
    %c0_i32 = arith.constant 0 : i32
    %c0_i32_0 = arith.constant 0 : i32
    return %arg0, %c0_i32 : i32, i32
  }
  func.func @transform_1(%arg0: i32) -> (i32, i32, i32) {
    %c0_i32 = arith.constant 0 : i32
    %c0_i32_0 = arith.constant 0 : i32
    %c0_i32_1 = arith.constant 0 : i32
    return %c0_i32, %arg0, %c0_i32_0 : i32, i32, i32
  }
  func.func @transform_2(%arg0: i32) -> (i32, i32, i32) {
    %c0_i32 = arith.constant 0 : i32
    %c0_i32_0 = arith.constant 0 : i32
    %c0_i32_1 = arith.constant 0 : i32
    return %c0_i32, %arg0, %c0_i32_0 : i32, i32, i32
  }
  func.func @transform_3(%arg0: i32) -> (i32, i32) {
    %c0_i32 = arith.constant 0 : i32
    %c0_i32_0 = arith.constant 0 : i32
    return %arg0, %c0_i32 : i32, i32
  }
  func.func @transform_4(%arg0: i32) -> (i32, i32) {
    %c0_i32 = arith.constant 0 : i32
    %c0_i32_0 = arith.constant 0 : i32
    %c0_i32_1 = arith.constant 0 : i32
    return %c0_i32, %c0_i32_0 : i32, i32
  }
  func.func @transform_5(%arg0: i32) -> (i32, i32) {
    %c0_i32 = arith.constant 0 : i32
    %c0_i32_0 = arith.constant 0 : i32
    %c0_i32_1 = arith.constant 0 : i32
    return %c0_i32, %c0_i32_0 : i32, i32
  }
  func.func @transform_6(%arg0: i32) -> (i32, i32) {
    %c0_i32 = arith.constant 0 : i32
    %c0_i32_0 = arith.constant 0 : i32
    %c0_i32_1 = arith.constant 0 : i32
    return %c0_i32, %c0_i32_0 : i32, i32
  }
  func.func @transform_7(%arg0: i32) -> (i32, i32) {
    %c0_i32 = arith.constant 0 : i32
    %c0_i32_0 = arith.constant 0 : i32
    %c0_i32_1 = arith.constant 0 : i32
    return %c0_i32, %c0_i32_0 : i32, i32
  }
  func.func @transform_8(%arg0: i32) -> (i32, i32) {
    %c0_i32 = arith.constant 0 : i32
    %c0_i32_0 = arith.constant 0 : i32
    %c0_i32_1 = arith.constant 0 : i32
    return %c0_i32, %c0_i32_0 : i32, i32
  }
  func.func @transform_9(%arg0: i32) -> (i32, i32) {
    %c0_i32 = arith.constant 0 : i32
    %c0_i32_0 = arith.constant 0 : i32
    %c0_i32_1 = arith.constant 0 : i32
    return %c0_i32, %c0_i32_0 : i32, i32
  }
  func.func @transform_10(%arg0: i32) -> (i32, i32) {
    %c0_i32 = arith.constant 0 : i32
    %c0_i32_0 = arith.constant 0 : i32
    %c0_i32_1 = arith.constant 0 : i32
    return %c0_i32, %c0_i32_0 : i32, i32
  }
  func.func @transform_11(%arg0: i32) -> (i32, i32) {
    %c0_i32 = arith.constant 0 : i32
    %c0_i32_0 = arith.constant 0 : i32
    %c0_i32_1 = arith.constant 0 : i32
    return %c0_i32, %c0_i32_0 : i32, i32
  }
  func.func @transform_12(%arg0: i32) -> (i32, i32) {
    %c0_i32 = arith.constant 0 : i32
    %c0_i32_0 = arith.constant 0 : i32
    %c0_i32_1 = arith.constant 0 : i32
    return %c0_i32, %c0_i32_0 : i32, i32
  }
  func.func @transform_13(%arg0: i32) -> (i32, i32) {
    %c0_i32 = arith.constant 0 : i32
    %c0_i32_0 = arith.constant 0 : i32
    %c0_i32_1 = arith.constant 0 : i32
    return %c0_i32, %c0_i32_0 : i32, i32
  }
  func.func @transform_14(%arg0: i32) -> (i32, i32) {
    %c0_i32 = arith.constant 0 : i32
    %c0_i32_0 = arith.constant 0 : i32
    %c0_i32_1 = arith.constant 0 : i32
    return %c0_i32, %c0_i32_0 : i32, i32
  }
  func.func @transform_15(%arg0: i32) -> (i32, i32) {
    %c0_i32 = arith.constant 0 : i32
    %c0_i32_0 = arith.constant 0 : i32
    %c0_i32_1 = arith.constant 0 : i32
    return %c0_i32, %c0_i32_0 : i32, i32
  }
  func.func @transform_16(%arg0: i32) -> (i32, i32) {
    %c0_i32 = arith.constant 0 : i32
    %c0_i32_0 = arith.constant 0 : i32
    %c0_i32_1 = arith.constant 0 : i32
    return %c0_i32, %c0_i32_0 : i32, i32
  }
  func.func @transform_17(%arg0: i32) -> (i32, i32) {
    %c0_i32 = arith.constant 0 : i32
    %c0_i32_0 = arith.constant 0 : i32
    return %arg0, %c0_i32 : i32, i32
  }
}

</mosaic_0001>

<bundles_post_ra>
// kernel: tpu_custom_call.1
= control target key start
LH: loop header
LB: loop body
LE: loop exit
PB: predicated region body
PF: predicated region fallthrough
CT: control target
= control target key end

     0   :  { %s1953_s0 = inlined_call_operand.vmem [shape: f32[16,32], index: 0, kind: input, shape index: {}]   ;;  %s1954_s1 = inlined_call_operand.vmem [shape: f32[4,16,64], index: 1, kind: input, shape index: {}]   ;;  %s1955_s2 = inlined_call_operand.vmem [shape: f32[4,16,1], index: 2, kind: input, shape index: {}]   ;;  %s1956_s3 = inlined_call_operand.vmem [shape: f32[16,1], index: 3, kind: input, shape index: {}]   ;;  %s1957_s4 = inlined_call_operand.vmem [shape: f32[32,32], index: 4, kind: input, shape index: {}]   ;;  %s1958_s5 = inlined_call_operand.vmem [shape: f32[64,64], index: 5, kind: input, shape index: {}]   ;;  %s1959_s6 = inlined_call_operand.vmem [shape: f32[32,4], index: 6, kind: input, shape index: {}]   ;;  %s1960_s7 = inlined_call_operand.vmem [shape: f32[4,32], index: 7, kind: input, shape index: {}]   ;;  %s1961_s8 = inlined_call_operand.vmem [shape: f32[32,32], index: 8, kind: input, shape index: {}]   ;;  %s1962_s9 = inlined_call_operand.vmem [shape: f32[32,128], index: 9, kind: input, shape index: {}]   ;;  %s1963_s10 = inlined_call_operand.vmem [shape: f32[1,128], index: 10, kind: input, shape index: {}]   ;;  %s1964_s11 = inlined_call_operand.vmem [shape: f32[128,32], index: 11, kind: input, shape index: {}]   ;;  %s1965_s12 = inlined_call_operand.vmem [shape: f32[1,32], index: 12, kind: input, shape index: {}]   ;;  %s1966_s13 = inlined_call_operand.vmem [shape: f32[1,32], index: 13, kind: input, shape index: {}]   ;;  %s1967_s14 = inlined_call_operand.vmem [shape: f32[1,32], index: 14, kind: input, shape index: {}]   ;;  %s1968_s15 = inlined_call_operand.vmem [shape: f32[1,32], index: 15, kind: input, shape index: {}]   ;;  %s1969_s16 = inlined_call_operand.vmem [shape: f32[1,32], index: 16, kind: input, shape index: {}]   ;;  %s1970_s17 = inlined_call_operand.hbm [shape: f32[16,32], index: 17, kind: output, shape index: {}]  }
   0x1   :  { %1973 = sst [smem:[#allocation5_spill]] %s1953_s0 }
   0x2   :  { %1974 = sst [smem:[#allocation6_spill]] %s1954_s1 }
   0x3   :  { %v170_v0 = vld [vmem:[%s1958_s5 + $0x38] sm:$0xff]  ;;  %v169_v1 = vld [vmem:[%s1958_s5 + $0x30] sm:$0xff]  ;;  %v1545_v3 = vmov 0   ;;  %v168_v4 = vld [vmem:[%s1958_s5 + $0x28] sm:$0xff]  ;;  %s1975_s29 = sld [smem:[#allocation5_spill]]  ;;  %vm73_vm0 = vcmask 261120  }
   0x4   :  { %1353 = vmatprep.subr.mxu1 %v170_v0  ;;  %v72_v2 = vld [vmem:[%s1957_s4 + $0x18] sm:$0xff]  ;;  %1485 = vset.pattern.permute.xlu0 %v1545_v3  ;;  %v71_v5 = vld [vmem:[%s1957_s4 + $0x10] sm:$0xff]  ;;  %v70_v6 = vld [vmem:[%s1957_s4 + $0x8] sm:$0xff]  ;;  %s1976_s22 = sld [smem:[#allocation6_spill]]  ;;  %vm171_vm1 = vcmask 523264  }
   0x5   :  { %1354 = vmatpush3.msra.mxu1 %v170_v0  ;;  %1342 = vmatprep.subr.mxu0 %v72_v2  ;;  %v167_v7 = vld [vmem:[%s1958_s5 + $0x20] sm:$0xff]  ;;  %v166_v9 = vld [vmem:[%s1958_s5 + $0x18] sm:$0xff]  ;;  %v165_v13 = vld [vmem:[%s1958_s5 + $0x10] sm:$0xff] }
   0x6   :  { %1355 = vmatprep.subr.mxu1 %v169_v1  ;;  %1343 = vmatpush3.msra.mxu0 %v72_v2  ;;  %v69_v8 = vld [vmem:[%s1957_s4] sm:$0xff]  ;;  %v1693_v15 = vld [vmem:[%s1955_s2 + $0x10] sm:$0xff]  ;;  %v164_v17 = vld [vmem:[%s1958_s5 + $0x8] sm:$0xff] }
   0x7   :  { %1356 = vmatpush3.msra.mxu1 %v169_v1  ;;  %1344 = vmatprep.subr.mxu0 %v71_v5  ;;  %v1676_v11 = vld [vmem:[%s1955_s2] sm:$0xff]  ;;  %v1710_v19 = vld [vmem:[%s1955_s2 + $0x30] sm:$0xff]  ;;  %vm444_vm4 = vcmp.gt.f32.partialorder %v1693_v15, 0.0  ;;  %v60_v22 = vld [vmem:[%s1955_s2 + $0x8] sm:$0xff] }
   0x8   :  { %1357 = vmatprep.subr.mxu1 %v168_v4  ;;  %1345 = vmatpush3.msra.mxu0 %v71_v5  ;;  %v1681_v12 = vld [vmem:[%s1955_s2 + $0x20] sm:$0xff]  ;;  %vm442_vm2 = vcmp.gt.f32.partialorder %v1676_v11, 0.0 }
   0x9   :  { %1358 = vmatpush3.msra.mxu1 %v168_v4  ;;  %1346 = vmatprep.subr.mxu0 %v70_v6  ;;  %v1671_v10 = vld [vmem:[%s1975_s29] sm:$0xff]  ;;  %v1698_v16 = vld [vmem:[%s1975_s29 + $0x8] sm:$0xff]  ;;  %vm446_vm3 = vcmp.gt.f32.partialorder %v1681_v12, 0.0  ;;  %v450_v18 = vsel %vm442_vm2, 1, %v1545_v3 }
   0xa   :  { %1359 = vmatprep.subr.mxu1 %v167_v7  ;;  %1347 = vmatpush3.msra.mxu0 %v70_v6  ;;  %v155_v14 = vld [vmem:[%s1976_s22] sm:$0xff]  ;;  %v454_v21 = vsel %vm446_vm3, 1, %v1545_v3 }
   0xb   :  { %1360 = vmatpush3.msra.mxu1 %v167_v7  ;;  %1348 = vmatprep.subr.mxu0 %v69_v8  ;;  %v163_v20 = vld [vmem:[%s1958_s5] sm:$0xff] }
   0xc   :  { %1361 = vmatprep.subr.mxu1 %v166_v9  ;;  %1349 = vmatpush3.msra.mxu0 %v69_v8 }
   0xd   :  { %1362 = vmatpush3.msra.mxu1 %v166_v9  ;;  %1350 = vmatprep.mubr.msk.f32.mxu0 %vm73_vm0, %v1671_v10 }
   0xe   :  { %1363 = vmatprep.subr.mxu1 %v165_v13  ;;  %1369 = vmatprep.mubr.msk.f32.mxu1 %vm171_vm1, %v155_v14 }
   0xf   :  { %1364 = vmatpush3.msra.mxu1 %v165_v13  ;;  %1351 = vmatmul.mubr.msk.f32.vlgmr.msra.gmra.mxu0 %vm73_vm0, %v1698_v16 }
  0x10   :  { %22 = vsyncpa [#allocation3], 0  ;;  %1365 = vmatprep.subr.mxu1 %v164_v17  ;;  %459 = vperm.xlu0 %1485, %v450_v18   ;;  %vm448_vm5 = vcmp.gt.f32.partialorder %v1710_v19, 0.0  ;;  %v312_v23 = vld [vmem:[%s1959_s6 + $0x18] sm:$0xff]  ;;  %v156_v24 = vld [vmem:[%s1976_s22 + $0x8] sm:$0xff]  ;;  %v452_v25 = vsel %vm444_vm4, 1, %v1545_v3 }
  0x11   :  { %1366 = vmatpush3.msra.mxu1 %v164_v17  ;;  %1486 = vset.pattern.permute.xlu1 %v1545_v3  ;;  %v62_v26 = vld [vmem:[%s1955_s2 + $0x18] sm:$0xff]  ;;  %v157_v27 = vld [vmem:[%s1976_s22 + $0x10] sm:$0xff]  ;;  %vm443_vm6 = vcmp.gt.f32.partialorder %v60_v22, 0.0  ;;  %v456_v28 = vsel %vm448_vm5, 1, %v1545_v3  ;;  %v64_v29 = vld [vmem:[%s1955_s2 + $0x28] sm:$0xff]  ;;  %s1546_s0 = smov 96  }
  0x12   :  { %1367 = vmatprep.subr.mxu1 %v163_v20  ;;  %471 = vperm.xlu1 %1486, %v454_v21   ;;  %vm445_vm7 = vcmp.gt.f32.partialorder %v62_v26, 0.0  ;;  %v158_v30 = vld [vmem:[%s1976_s22 + $0x18] sm:$0xff]  ;;  %v451_v31 = vsel %vm443_vm6, 1, %v1545_v3  ;;  %v159_v33 = vld [vmem:[%s1976_s22 + $0x20] sm:$0xff]  ;;  %vm447_vm8 = vcmp.gt.f32.partialorder %v64_v29, 0.0  ;;  %v311_v34 = vld [vmem:[%s1959_s6 + $0x10] sm:$0xff] }
  0x13   :  { %1368 = vmatpush3.msra.mxu1 %v163_v20  ;;  %1381 = vmatprep.subr.mxu0 %v312_v23  ;;  %v66_v32 = vld [vmem:[%s1955_s2 + $0x38] sm:$0xff]  ;;  %v453_v35 = vsel %vm445_vm7, 1, %v1545_v3  ;;  %v160_v36 = vld [vmem:[%s1976_s22 + $0x28] sm:$0xff]  ;;  %v455_v37 = vsel %vm447_vm8, 1, %v1545_v3  ;;  %v161_v38 = vld [vmem:[%s1976_s22 + $0x30] sm:$0xff]  ;;  %vm636_vm10 = vcmask 1043456  }
  0x14   :  { %1370 = vmatmul.mubr.msk.f32.vlgmr.msra.gmra.mxu1 %vm171_vm1, %v156_v24  ;;  %465 = vperm.xlu0 %1485, %v452_v25   ;;  %vm449_vm9 = vcmp.gt.f32.partialorder %v66_v32, 0.0  ;;  %v162_v40 = vld [vmem:[%s1976_s22 + $0x38] sm:$0xff]  ;;  %v310_v41 = vld [vmem:[%s1959_s6 + $0x8] sm:$0xff]  ;;  %v309_v42 = vld [vmem:[%s1959_s6] sm:$0xff]  ;;  %s1547_s26 = smov [#allocation2]  }
  0x15   :  { %1372 = vmatprep.mubr.msk.f32.mxu1 %vm171_vm1, %v157_v27  ;;  %1472 = vmatprep.subr.mxu1 %v312_v23  ;;  %v457_v39 = vsel %vm449_vm9, 1, %v1545_v3  ;;  %v611_v61 = vld [vmem:[%s1960_s7] sm:$0xf]  ;;  %s1221_s27 = sshll.u32 %s1547_s26, 4  ;;  %s1222_s27 = int_to_ptr.vmem [resolvable:$true] %s1221_s27 }
  0x16   :  { %477 = vperm.xlu1 %1486, %v456_v28   ;;  %1476 = vmatpush3.msra.mxu1 %v312_v23  ;;  %p1528_p1 = scmp.lt.s32.totalorder %s1222_s27, %s1222_s27 }
  0x17   :  { %1473 = vmatprep.subr.mxu1 %v311_v34  ;;  %1382 = vmatpush3.msra.mxu0 %v312_v23 }
  0x18   :  { %1373 = vmatmul.mubr.msk.f32.gmra.mxu1 %vm171_vm1, %v158_v30  ;;  %462 = vperm.xlu0 %1485, %v451_v31  }
  0x19   :  { %1375 = vmatprep.mubr.msk.f32.mxu1 %vm171_vm1, %v159_v33  ;;  %1477 = vmatpush3.msra.mxu1 %v311_v34 }
  0x1a   :  { %468 = vperm.xlu1 %1486, %v453_v35   ;;  %1383 = vmatprep.subr.mxu0 %v311_v34 }
  0x1b   :  { %1384 = vmatpush3.msra.mxu0 %v311_v34  ;;  %1474 = vmatprep.subr.mxu1 %v310_v41 }
  0x1c   :  { %1376 = vmatmul.mubr.msk.f32.gmra.mxu1 %vm171_vm1, %v160_v36  ;;  %474 = vperm.xlu0 %1485, %v455_v37  }
  0x1d   :  { %1378 = vmatprep.mubr.msk.f32.mxu1 %vm171_vm1, %v161_v38  ;;  %1385 = vmatprep.subr.mxu0 %v310_v41 }
  0x1e   :  { %480 = vperm.xlu1 %1486, %v457_v39   ;;  %1478 = vmatpush3.msra.mxu1 %v310_v41 }
  0x1f   :  { %1386 = vmatpush3.msra.mxu0 %v310_v41  ;;  %1475 = vmatprep.subr.mxu1 %v309_v42 }
  0x20   :  { %1379 = vmatmul.mubr.msk.f32.gmra.mxu1 %vm171_vm1, %v162_v40  ;;  %553 = vperm.xlu0 %1485, %v1676_v11   ;;  %vm498_vm1 = vcmask 31744  }
  0x21   :  { %1387 = vmatprep.subr.mxu0 %v309_v42  ;;  %1479 = vmatpush3.msra.mxu1 %v309_v42 }
  0x22   :  { %558 = vperm.xlu1 %1486, %v60_v22   ;;  %1388 = vmatpush3.msra.mxu0 %v309_v42 }
  0x23   :  { %1401 = vmatprep.subr.msk.mxu0 %vm636_vm10, %v611_v61 }
  0x24   :  { %563 = vperm.xlu0 %1485, %v1693_v15  }
  0x26   :  { %568 = vperm.xlu1 %1486, %v62_v26  }
  0x28   :  { %573 = vperm.xlu0 %1485, %v1681_v12  }
  0x2a   :  { %578 = vperm.xlu1 %1486, %v64_v29  }
  0x2c   :  { %583 = vperm.xlu0 %1485, %v1710_v19  }
  0x2e   :  { %588 = vperm.xlu1 %1486, %v66_v32  }
  0x8b   :  { %v460_v62 = vpop.permute.xlu0 %459 }
  0x8c   :  { %vm482_vm14 = vcmp.eq.s32.totalorder %v460_v62, 1 }
  0x8d   :  { %v472_v63 = vpop.permute.xlu1 %471 }
  0x8e   :  { %vm486_vm15 = vcmp.eq.s32.totalorder %v472_v63, 1 }
  0x8f   :  { %v466_v0 = vpop.permute.xlu0 %465 }
  0x90   :  { %vm484_vm2 = vcmp.eq.s32.totalorder %v466_v0, 1 }
  0x91   :  { %v478_v1 = vpop.permute.xlu1 %477 }
  0x92   :  { %vm488_vm4 = vcmp.eq.s32.totalorder %v478_v1, 1 }
  0x93   :  { %v463_v2 = vpop.permute.xlu0 %462 }
  0x94   :  { %vm483_vm11 = vcmp.eq.s32.totalorder %v463_v2, 1 }
  0x95   :  { %v469_v4 = vpop.permute.xlu1 %468 }
  0x96   :  { %vm485_vm12 = vcmp.eq.s32.totalorder %v469_v4, 1 }
  0x97   :  { %v475_v6 = vpop.permute.xlu0 %474 }
  0x98   :  { %vm487_vm13 = vcmp.eq.s32.totalorder %v475_v6, 1 }
  0x99   :  { %v481_v12 = vpop.permute.xlu1 %480 }
  0x9a   :  { %vm489_vm3 = vcmp.eq.s32.totalorder %v481_v12, 1 }
  0xcf   :  { %v1352_v43 = vpop.f32.mrf.mxu0 }
  0xd1   :  { %v146_v45 = vpop.f32.mrf.mxu0 }
  0xd4   :  { %v1371_v44 = vpop.f32.mrf.mxu1 }
  0xd5   :  { %755 = vrot.lane.b32.xlu0 %v1371_v44, %s1546_s0  ;;  %v302_v49 = vmul.f32 %v1371_v44, %v1352_v43 }
  0xd6   :  { %v262_v46 = vpop.f32.mrf.mxu1 }
  0xd7   :  { %v301_v47 = vmul.f32 %v262_v46, %v146_v45 }
  0xd8   :  { %v1374_v48 = vpop.f32.mrf.mxu1 }
  0xd9   :  { %759 = vrot.lane.b32.xlu1 %v1374_v48, %s1546_s0  ;;  %753 = vrot.lane.b32.xlu0 %v262_v46, %s1546_s0  ;;  %v304_v52 = vmul.f32 %v1374_v48, %v1352_v43 }
  0xda   :  { %1389 = vmatprep.mubr.msk.f32.mxu0 %vm73_vm0, %v301_v47  ;;  %v272_v50 = vpop.f32.mrf.mxu1 }
  0xdb   :  { %v303_v51 = vmul.f32 %v272_v50, %v146_v45  ;;  %1390 = vmatmul.mubr.msk.f32.vlgmr.msra.gmra.mxu0 %vm73_vm0, %v302_v49 }
  0xdc   :  { %v1377_v53 = vpop.f32.mrf.mxu1  ;;  %1402 = vmatpush3.msk.msra.mxu0 %vm636_vm10, %v611_v61 }
  0xdd   :  { %757 = vrot.lane.b32.xlu1 %v272_v50, %s1546_s0  ;;  %1392 = vmatprep.mubr.msk.f32.mxu1 %vm73_vm0, %v303_v51  ;;  %v306_v56 = vmul.f32 %v1377_v53, %v1352_v43 }
  0xde   :  { %v282_v54 = vpop.f32.mrf.mxu1  ;;  %1393 = vmatmul.mubr.msk.f32.vlgmr.msra.gmra.mxu1 %vm73_vm0, %v304_v52 }
  0xdf   :  { %v305_v55 = vmul.f32 %v282_v54, %v146_v45  ;;  %761 = vrot.lane.b32.xlu0 %v282_v54, %s1546_s0 }
  0xe0   :  { %v1380_v57 = vpop.f32.mrf.mxu1 }
  0xe1   :  { %763 = vrot.lane.b32.xlu1 %v1377_v53, %s1546_s0  ;;  %1395 = vmatprep.mubr.msk.f32.mxu1 %vm73_vm0, %v305_v55  ;;  %v308_v60 = vmul.f32 %v1380_v57, %v1352_v43 }
  0xe2   :  { %v292_v58 = vpop.f32.mrf.mxu1  ;;  %1396 = vmatmul.mubr.msk.f32.gmra.mxu1 %vm73_vm0, %v306_v56 }
  0xe3   :  { %v307_v59 = vmul.f32 %v292_v58, %v146_v45  ;;  %765 = vrot.lane.b32.xlu0 %v292_v58, %s1546_s0 }
  0xe5   :  { %767 = vrot.lane.b32.xlu1 %v1380_v57, %s1546_s0  ;;  %1398 = vmatprep.mubr.msk.f32.mxu1 %vm73_vm0, %v307_v59 }
  0xe6   :  { %1399 = vmatmul.mubr.msk.f32.gmra.mxu1 %vm73_vm0, %v308_v60 }
 0x19b   :  { %v1391_v7 = vpop.f32.mrf.mxu0 }
 0x19c   :  { %v491_v13 = vsel %vm483_vm11, %v1391_v7, -3.4028235e+38 }
 0x19d   :  { %v403_v14 = vpop.f32.mrf.mxu0  ;;  %v506_v22 = vsel %vm498_vm1, %v491_v13, -inf }
 0x19e   :  { %v1394_v3 = vpop.f32.mrf.mxu1  ;;  %v490_v23 = vsel %vm482_vm14, %v403_v14, -3.4028235e+38  ;;  %v559_v14 = vpop.permute.xlu1 %558 }
 0x19f   :  { %v493_v15 = vsel %vm485_vm12, %v1394_v3, -3.4028235e+38  ;;  %v499_v33 = vsel %vm498_vm1, %v490_v23, -inf }
 0x1a0   :  { %v413_v5 = vpop.f32.mrf.mxu1  ;;  %v507_v24 = vsel %vm498_vm1, %v493_v15, -inf }
 0x1a1   :  { %v492_v20 = vsel %vm484_vm2, %v413_v5, -3.4028235e+38 }
 0x1a2   :  { %v1397_v8 = vpop.f32.mrf.mxu1  ;;  %v500_v31 = vsel %vm498_vm1, %v492_v20, -inf }
 0x1a3   :  { %v495_v9 = vsel %vm487_vm13, %v1397_v8, -3.4028235e+38 }
 0x1a4   :  { %v423_v11 = vpop.f32.mrf.mxu1  ;;  %v508_v17 = vsel %vm498_vm1, %v495_v9, -inf }
 0x1a5   :  { %v494_v18 = vsel %vm486_vm15, %v423_v11, -3.4028235e+38  ;;  %v509_v27 = vmax.f32 %v506_v22, %v508_v17 }
 0x1a6   :  { %v1400_v19 = vpop.f32.mrf.mxu1  ;;  %v501_v28 = vsel %vm498_vm1, %v494_v18, -inf }
 0x1a7   :  { %v497_v21 = vsel %vm489_vm3, %v1400_v19, -3.4028235e+38  ;;  %v502_v36 = vmax.f32 %v499_v33, %v501_v28 }
 0x1a8   :  { %v510_v25 = vsel %vm498_vm1, %v497_v21, -inf  ;;  %v433_v26 = vpop.f32.mrf.mxu1 }
 0x1a9   :  { %v511_v29 = vmax.f32 %v507_v24, %v510_v25  ;;  %v496_v30 = vsel %vm488_vm4, %v433_v26, -3.4028235e+38 }
 0x1aa   :  { %v503_v32 = vsel %vm498_vm1, %v496_v30, -inf }
 0x1ab   :  { %v512_v34 = vmax.f32 %v509_v27, %v511_v29  ;;  %v504_v35 = vmax.f32 %v500_v31, %v503_v32 }
 0x1ad   :  { %v514_v37 = vsub.f32 %v491_v13, %v512_v34  ;;  %v516_v38 = vsub.f32 %v493_v15, %v512_v34  ;;  %v518_v39 = vsub.f32 %v495_v9, %v512_v34  ;;  %v520_v40 = vsub.f32 %v497_v21, %v512_v34  ;;  %v554_v13 = vpop.permute.xlu0 %553 }
 0x1ae   :  { %v505_v41 = vmax.f32 %v502_v36, %v504_v35 }
 0x1af   :  { %v523_v42 = vmul.f32 1.442695, %v514_v37  ;;  %v527_v43 = vmul.f32 1.442695, %v516_v38  ;;  %v531_v44 = vmul.f32 1.442695, %v518_v39 }
 0x1b0   :  { %v535_v45 = vmul.f32 1.442695, %v520_v40  ;;  %v513_v46 = vsub.f32 %v490_v23, %v505_v41  ;;  %v515_v47 = vsub.f32 %v492_v20, %v505_v41  ;;  %v517_v48 = vsub.f32 %v494_v18, %v505_v41  ;;  %v569_v18 = vpop.permute.xlu1 %568  ;;  %v802_v40 = vld [vmem:[%s1961_s8 + $0x18] sm:$0xff] }
 0x1b1   :  { %1487 = vpow2.f32 %v523_v42  ;;  %v519_v49 = vsub.f32 %v496_v30, %v505_v41  ;;  %v564_v15 = vpop.permute.xlu0 %563  ;;  %1415 = vmatprep.subr.mxu1 %v802_v40  ;;  %v801_v41 = vld [vmem:[%s1961_s8 + $0x10] sm:$0xff]  ;;  %v800_v42 = vld [vmem:[%s1961_s8 + $0x8] sm:$0xff] }
 0x1b2   :  { %1489 = vpow2.f32 %v527_v43  ;;  %v521_v50 = vmul.f32 1.442695, %v513_v46  ;;  %v525_v51 = vmul.f32 1.442695, %v515_v47  ;;  %v529_v52 = vmul.f32 1.442695, %v517_v48  ;;  %1416 = vmatpush3.msra.mxu1 %v802_v40 }
 0x1b3   :  { %1491 = vpow2.f32 %v531_v44  ;;  %v533_v53 = vmul.f32 1.442695, %v519_v49  ;;  %1417 = vmatprep.subr.mxu1 %v801_v41  ;;  %v799_v43 = vld [vmem:[%s1961_s8] sm:$0xff]  ;;  %v1055_v40 = vld [vmem:[%s1964_s11 + $0x68] sm:$0xff] }
 0x1b4   :  { %1493 = vpow2.f32 %v535_v45  ;;  %v579_v28 = vpop.permute.xlu1 %578  ;;  %1418 = vmatpush3.msra.mxu1 %v801_v41  ;;  %v1054_v41 = vld [vmem:[%s1964_s11 + $0x60] sm:$0xff] }
 0x1b5   :  { %1495 = vpow2.f32 %v521_v50  ;;  %v574_v24 = vpop.permute.xlu0 %573  ;;  %1419 = vmatprep.subr.mxu1 %v800_v42 }
 0x1b6   :  { %1497 = vpow2.f32 %v525_v51  ;;  %1420 = vmatpush3.msra.mxu1 %v800_v42  ;;  %v1053_v42 = vld [vmem:[%s1964_s11 + $0x58] sm:$0xff] }
 0x1b7   :  { %1499 = vpow2.f32 %v529_v52  ;;  %1421 = vmatprep.subr.mxu1 %v799_v43 }
 0x1b8   :  { %1501 = vpow2.f32 %v533_v53  ;;  %v589_v36 = vpop.permute.xlu1 %588  ;;  %1422 = vmatpush3.msra.mxu1 %v799_v43  ;;  %v1052_v43 = vld [vmem:[%s1964_s11 + $0x50] sm:$0xff] }
 0x1b9   :  { %v584_v32 = vpop.permute.xlu0 %583 }
 0x1bc   :  { %v760_v44 = vpop.permute.xlu1 %759 }
 0x1bd   :  { %v756_v45 = vpop.permute.xlu0 %755 }
 0x1be   :  { %v1488_v54 = vpop.eup %1487 }
 0x1bf   :  { %v1490_v55 = vpop.eup %1489  ;;  %v544_v56 = vsel %vm498_vm1, %v1488_v54, 0.0  ;;  %v592_v21 = vmul.f32 %v1488_v54, %v559_v14 }
 0x1c0   :  { %v1492_v57 = vpop.eup %1491  ;;  %v545_v58 = vsel %vm498_vm1, %v1490_v55, 0.0  ;;  %v594_v27 = vmul.f32 %v1490_v55, %v569_v18  ;;  %v758_v46 = vpop.permute.xlu1 %757 }
 0x1c1   :  { %v1494_v59 = vpop.eup %1493  ;;  %v546_v60 = vadd.f32 %v545_v58, %v544_v56  ;;  %v547_v62 = vsel %vm498_vm1, %v1492_v57, 0.0  ;;  %v596_v33 = vmul.f32 %v1492_v57, %v579_v28  ;;  %v754_v49 = vpop.permute.xlu0 %753 }
 0x1c2   :  { %v1496_v61 = vpop.eup %1495  ;;  %v549_v5 = vsel %vm498_vm1, %v1494_v59, 0.0  ;;  %v598_v38 = vmul.f32 %v1494_v59, %v589_v36  ;;  %v949_v36 = vld [vmem:[%s1962_s9 + $0x8] sm:$0xff] }
 0x1c3   :  { %v1498_v63 = vpop.eup %1497  ;;  %v548_v0 = vadd.f32 %v547_v62, %v546_v60  ;;  %v537_v1 = vsel %vm498_vm1, %v1496_v61, 0.0  ;;  %v591_v19 = vmul.f32 %v1496_v61, %v554_v13 }
 0x1c4   :  { %v1500_v2 = vpop.eup %1499  ;;  %v538_v3 = vsel %vm498_vm1, %v1498_v63, 0.0  ;;  %v593_v23 = vmul.f32 %v1498_v63, %v564_v15  ;;  %v764_v51 = vpop.permute.xlu1 %763 }
 0x1c5   :  { %v1502_v4 = vpop.eup %1501  ;;  %v539_v6 = vadd.f32 %v538_v3, %v537_v1  ;;  %v550_v7 = vadd.f32 %v549_v5, %v548_v0  ;;  %v540_v8 = vsel %vm498_vm1, %v1500_v2, 0.0  ;;  %v595_v29 = vmul.f32 %v1500_v2, %v574_v24  ;;  %v762_v54 = vpop.permute.xlu0 %761 }
 0x1c6   :  { %v542_v11 = vsel %vm498_vm1, %v1502_v4, 0.0  ;;  %v597_v34 = vmul.f32 %v1502_v4, %v584_v32 }
 0x1c7   :  { %v541_v9 = vadd.f32 %v540_v8, %v539_v6  ;;  %1503 = vrcp.f32 %v550_v7 }
 0x1c8   :  { %v768_v63 = vpop.permute.xlu1 %767 }
 0x1c9   :  { %v543_v12 = vadd.f32 %v542_v11, %v541_v9  ;;  %v766_v5 = vpop.permute.xlu0 %765 }
 0x1cb   :  { %1505 = vrcp.f32 %v543_v12 }
 0x1d4   :  { %v1504_v17 = vpop.eup %1503 }
 0x1d5   :  { %v604_v25 = vmul.f32 %v1504_v17, %v592_v21  ;;  %v606_v30 = vmul.f32 %v1504_v17, %v594_v27  ;;  %v608_v35 = vmul.f32 %v1504_v17, %v596_v33  ;;  %v610_v39 = vmul.f32 %v1504_v17, %v598_v38  ;;  %v1057_v38 = vld [vmem:[%s1964_s11 + $0x78] sm:$0xff] }
 0x1d6   :  { %1437 = vmatprep.subr.mxu0 %v1057_v38 }
 0x1d8   :  { %v1506_v20 = vpop.eup %1505 }
 0x1d9   :  { %v603_v22 = vmul.f32 %v1506_v20, %v591_v19  ;;  %v605_v26 = vmul.f32 %v1506_v20, %v593_v23  ;;  %v607_v31 = vmul.f32 %v1506_v20, %v595_v29  ;;  %v609_v37 = vmul.f32 %v1506_v20, %v597_v34  ;;  %v951_v34 = vld [vmem:[%s1962_s9 + $0x18] sm:$0xff] }
 0x1da   :  { %1426 = vmatprep.subr.mxu1 %v951_v34 }
 0x1db   :  { %1403 = vmatprep.mubr.msk.f32.mxu0 %vm498_vm1, %v603_v22 }
 0x1dc   :  { %1404 = vmatmul.mubr.msk.f32.vlgmr.msra.gmra.mxu0 %vm498_vm1, %v604_v25 }
 0x1dd   :  { %1406 = vmatprep.mubr.msk.f32.mxu0 %vm498_vm1, %v605_v26  ;;  %1438 = vmatpush3.msra.mxu0 %v1057_v38 }
 0x1e0   :  { %1407 = vmatmul.mubr.msk.f32.gmra.mxu0 %vm498_vm1, %v606_v30 }
 0x1e1   :  { %1409 = vmatprep.mubr.msk.f32.mxu0 %vm498_vm1, %v607_v31 }
 0x1e4   :  { %1410 = vmatmul.mubr.msk.f32.gmra.mxu0 %vm498_vm1, %v608_v35  ;;  %v950_v35 = vld [vmem:[%s1962_s9 + $0x10] sm:$0xff] }
 0x1e5   :  { %1412 = vmatprep.mubr.msk.f32.mxu0 %vm498_vm1, %v609_v37  ;;  %v948_v37 = vld [vmem:[%s1962_s9] sm:$0xff] }
 0x1e8   :  { %1413 = vmatmul.mubr.msk.f32.gmra.mxu0 %vm498_vm1, %v610_v39  ;;  %v1056_v39 = vld [vmem:[%s1964_s11 + $0x70] sm:$0xff] }
 0x1e9   :  { %1439 = vmatprep.subr.mxu0 %v1056_v39 }
 0x1ea   :  { %1440 = vmatpush3.msra.mxu0 %v1056_v39 }
 0x1eb   :  { %1441 = vmatprep.subr.mxu0 %v1055_v40 }
 0x1ec   :  { %1442 = vmatpush3.msra.mxu0 %v1055_v40 }
 0x1ed   :  { %1443 = vmatprep.subr.mxu0 %v1054_v41 }
 0x1ee   :  { %1444 = vmatpush3.msra.mxu0 %v1054_v41 }
 0x1ef   :  { %1445 = vmatprep.subr.mxu0 %v1053_v42 }
 0x1f0   :  { %1446 = vmatpush3.msra.mxu0 %v1053_v42 }
 0x1f1   :  { %1447 = vmatprep.subr.mxu0 %v1052_v43 }
 0x1f2   :  { %1448 = vmatpush3.msra.mxu0 %v1052_v43 }
 0x29c   :  { %v1405_v47 = vpop.f32.mrf.mxu0 }
 0x29d   :  { %v778_v58 = vmul.f32 %v1405_v47, %v756_v45  ;;  %v1050_v45 = vld [vmem:[%s1964_s11 + $0x40] sm:$0xff]  ;;  %v1048_v47 = vld [vmem:[%s1964_s11 + $0x30] sm:$0xff] }
 0x29e   :  { %v706_v48 = vpop.f32.mrf.mxu0 }
 0x29f   :  { %v777_v57 = vmul.f32 %v754_v49, %v706_v48  ;;  %v792_v6 = vsel %vm73_vm0, %v778_v58, 0.0  ;;  %v1047_v48 = vld [vmem:[%s1964_s11 + $0x28] sm:$0xff]  ;;  %v1046_v49 = vld [vmem:[%s1964_s11 + $0x20] sm:$0xff] }
 0x2a0   :  { %v1408_v50 = vpop.f32.mrf.mxu0 }
 0x2a1   :  { %v780_v55 = vmul.f32 %v1408_v50, %v760_v44  ;;  %v785_v2 = vsel %vm73_vm0, %v777_v57, 0.0  ;;  %v1051_v44 = vld [vmem:[%s1964_s11 + $0x48] sm:$0xff] }
 0x2a2   :  { %v716_v52 = vpop.f32.mrf.mxu0  ;;  %1449 = vmatprep.subr.mxu0 %v1051_v44 }
 0x2a3   :  { %v779_v53 = vmul.f32 %v758_v46, %v716_v52  ;;  %v793_v0 = vsel %vm73_vm0, %v780_v55, 0.0  ;;  %1450 = vmatpush3.msra.mxu0 %v1051_v44  ;;  %v1049_v46 = vld [vmem:[%s1964_s11 + $0x38] sm:$0xff]  ;;  %v67_v44 = vld [vmem:[%s1956_s3] sm:$0xff] }
 0x2a4   :  { %v1411_v56 = vpop.f32.mrf.mxu0  ;;  %v794_v11 = vadd.f32 %v793_v0, %v792_v6  ;;  %1451 = vmatprep.subr.mxu0 %v1050_v45 }
 0x2a5   :  { %v782_v59 = vmul.f32 %v1411_v56, %v764_v51  ;;  %v786_v61 = vsel %vm73_vm0, %v779_v53, 0.0  ;;  %1452 = vmatpush3.msra.mxu0 %v1050_v45  ;;  %v68_v45 = vld [vmem:[%s1956_s3 + $0x8] sm:$0xff] }
 0x2a6   :  { %v726_v60 = vpop.f32.mrf.mxu0  ;;  %v787_v7 = vadd.f32 %v786_v61, %v785_v2  ;;  %1453 = vmatprep.subr.mxu0 %v1049_v46 }
 0x2a7   :  { %v781_v62 = vmul.f32 %v762_v54, %v726_v60  ;;  %v795_v8 = vsel %vm73_vm0, %v782_v59, 0.0  ;;  %1454 = vmatpush3.msra.mxu0 %v1049_v46 }
 0x2a8   :  { %v1414_v1 = vpop.f32.mrf.mxu0  ;;  %v796_v15 = vadd.f32 %v795_v8, %v794_v11  ;;  %1455 = vmatprep.subr.mxu0 %v1048_v47 }
 0x2a9   :  { %v788_v3 = vsel %vm73_vm0, %v781_v62, 0.0  ;;  %v784_v4 = vmul.f32 %v1414_v1, %v768_v63  ;;  %1456 = vmatpush3.msra.mxu0 %v1048_v47 }
 0x2aa   :  { %v736_v9 = vpop.f32.mrf.mxu0  ;;  %v789_v13 = vadd.f32 %v788_v3, %v787_v7  ;;  %1457 = vmatprep.subr.mxu0 %v1047_v48  ;;  %v1262_v7 = vld [vmem:[%s1967_s14] ss:$0 sm:$0xff] }
 0x2ab   :  { %v783_v12 = vmul.f32 %v766_v5, %v736_v9  ;;  %v797_v14 = vsel %vm73_vm0, %v784_v4, 0.0  ;;  %1458 = vmatpush3.msra.mxu0 %v1047_v48  ;;  %v1261_v4 = vld [vmem:[%s1966_s13] ss:$0 sm:$0xff] }
 0x2ac   :  { %v798_v19 = vadd.f32 %v797_v14, %v796_v15  ;;  %1459 = vmatprep.subr.mxu0 %v1046_v49  ;;  %v1045_v15 = vld [vmem:[%s1964_s11 + $0x18] sm:$0xff] }
 0x2ad   :  { %v790_v17 = vsel %vm73_vm0, %v783_v12, 0.0  ;;  %1460 = vmatpush3.msra.mxu0 %v1046_v49 }
 0x2ae   :  { %v791_v18 = vadd.f32 %v790_v17, %v789_v13  ;;  %1461 = vmatprep.subr.mxu0 %v1045_v15  ;;  %v1044_v17 = vld [vmem:[%s1964_s11 + $0x10] sm:$0xff] }
 0x2af   :  { %1462 = vmatpush3.msra.mxu0 %v1045_v15 }
 0x2b0   :  { %1423 = vmatprep.mubr.msk.f32.mxu1 %vm73_vm0, %v791_v18  ;;  %1463 = vmatprep.subr.mxu0 %v1044_v17  ;;  %v1043_v18 = vld [vmem:[%s1964_s11 + $0x8] sm:$0xff] }
 0x2b1   :  { %1424 = vmatmul.mubr.msk.f32.vlgmr.msra.gmra.mxu1 %vm73_vm0, %v798_v19  ;;  %1464 = vmatpush3.msra.mxu0 %v1044_v17  ;;  %v1042_v19 = vld [vmem:[%s1964_s11] sm:$0xff] }
 0x2b2   :  { %1427 = vmatpush3.msra.mxu1 %v951_v34  ;;  %1465 = vmatprep.subr.mxu0 %v1043_v18 }
 0x2b3   :  { %1428 = vmatprep.subr.mxu1 %v950_v35  ;;  %1466 = vmatpush3.msra.mxu0 %v1043_v18 }
 0x2b4   :  { %1429 = vmatpush3.msra.mxu1 %v950_v35  ;;  %1467 = vmatprep.subr.mxu0 %v1042_v19 }
 0x2b5   :  { %1430 = vmatprep.subr.mxu1 %v949_v36  ;;  %1468 = vmatpush3.msra.mxu0 %v1042_v19 }
 0x2b6   :  { %1431 = vmatpush3.msra.mxu1 %v949_v36 }
 0x2b7   :  { %1432 = vmatprep.subr.mxu1 %v948_v37 }
 0x2b8   :  { %1433 = vmatpush3.msra.mxu1 %v948_v37 }
 0x371   :  { %v1425_v20 = vpop.f32.mrf.mxu1 }
 0x372   :  { %v885_v21 = vadd.f32 %v1425_v20, %v1698_v16  ;;  %v1263_v20 = vld [vmem:[%s1963_s10] ss:$0 sm:$0xff] }
 0x373   :  { %v875_v22 = vpop.f32.mrf.mxu1 }
 0x374   :  { %v884_v23 = vadd.f32 %v875_v22, %v1671_v10  ;;  %v891_v24 = vsel %vm73_vm0, %v885_v21, 0.0 }
 0x375   :  { %892 = vadd.xlane.f32.xlu1 %v891_v24 }
 0x376   :  { %v888_v25 = vsel %vm73_vm0, %v884_v23, 0.0 }
 0x377   :  { %889 = vadd.xlane.f32.xlu0 %v888_v25 }
 0x3fe   :  { %v893_v26 = vpop.xlane.xlu1 %892 }
 0x3ff   :  { %v896_v27 = vmul.f32 0.03125, %v893_v26 }
 0x400   :  { %v890_v28 = vpop.xlane.xlu0 %889 }
 0x401   :  { %v895_v29 = vmul.f32 0.03125, %v890_v28  ;;  %v1846_v30 = vsub.f32 %v885_v21, %v896_v27  ;;  %v1266_v27 = vld [vmem:[%s1965_s12] ss:$0 sm:$0xff] }
 0x403   :  { %v1848_v31 = vsub.f32 %v884_v23, %v895_v29  ;;  %v900_v10 = vmul.f32 %v1846_v30, %v1846_v30  ;;  %v933_v11 = vmul.f32 %v1261_v4, %v1846_v30 }
 0x405   :  { %v899_v16 = vmul.f32 %v1848_v31, %v1848_v31  ;;  %v904_v33 = vsel %vm73_vm0, %v900_v10, 0.0  ;;  %v932_v5 = vmul.f32 %v1261_v4, %v1848_v31 }
 0x407   :  { %v901_v32 = vsel %vm73_vm0, %v899_v16, 0.0 }
 0x408   :  { %902 = vadd.xlane.f32.xlu0 %v901_v32 }
 0x40c   :  { %905 = vadd.xlane.f32.xlu0 %v904_v33 }
 0x491   :  { %v903_v50 = vpop.xlane.xlu0 %902 }
 0x492   :  { %v908_v51 = vmul.f32 0.032258064, %v903_v50 }
 0x494   :  { %v910_v52 = vadd.f32 1e-06, %v908_v51 }
 0x495   :  { %v906_v53 = vpop.xlane.xlu0 %905 }
 0x496   :  { %1507 = vrsqrt.f32 %v910_v52  ;;  %v909_v54 = vmul.f32 0.032258064, %v906_v53  ;;  %vm914_vm5 = vcmp.eq.f32.partialorder %v910_v52, inf  ;;  %v917_v58 = vand.u32 2147483648, %v910_v52 }
 0x497   :  { %vm916_vm6 = vcmp.eq.f32.partialorder %v910_v52, 0.0 }
 0x498   :  { %v911_v55 = vadd.f32 1e-06, %v909_v54 }
 0x49a   :  { %1509 = vrsqrt.f32 %v911_v55  ;;  %vm921_vm7 = vcmp.eq.f32.partialorder %v911_v55, inf  ;;  %v924_v0 = vand.u32 2147483648, %v911_v55  ;;  %vm923_vm8 = vcmp.eq.f32.partialorder %v911_v55, 0.0 }
 0x4a3   :  { %v1508_v56 = vpop.eup %1507 }
 0x4a4   :  { %v913_v57 = vmul.f32 %v1508_v56, %v910_v52 }
 0x4a6   :  { %v915_v59 = vsel %vm914_vm5, %v910_v52, %v913_v57 }
 0x4a7   :  { %v918_v60 = vsel %vm916_vm6, %v917_v58, %v915_v59  ;;  %v1510_v61 = vpop.eup %1509 }
 0x4a8   :  { %v934_v62 = vadd.f32 1e-06, %v918_v60  ;;  %v920_v63 = vmul.f32 %v1510_v61, %v911_v55 }
 0x4aa   :  { %1511 = vrcp.f32 %v934_v62  ;;  %v922_v1 = vsel %vm921_vm7, %v911_v55, %v920_v63 }
 0x4ab   :  { %v925_v2 = vsel %vm923_vm8, %v924_v0, %v922_v1  ;;  %v1267_v0 = vld [vmem:[%s1968_s15] ss:$0 sm:$0xff]  ;;  %s1523_s15 = scalar_lea.vmem %s1222_s27, 256 }
 0x4ac   :  { %v935_v3 = vadd.f32 1e-06, %v925_v2  ;;  %p1524_p0 = scmp.ne.s32.totalorder %s1222_s27, %s1523_s15  ;;  %p1529_p2 = scmp.lt.s32.totalorder %s1523_s15, %s1523_s15 }
 0x4ae   :  { %1513 = vrcp.f32 %v935_v3  ;;  %v1268_v3 = vld [vmem:[%s1969_s16] ss:$0 sm:$0xff]  ;;  %p1530_p3 = por %p1529_p2, %p1528_p1 }
 0x4b0   :  { %p1531_p4 = pnand %p1530_p3, %p1524_p0 }
 0x4b7   :  { %v1512_v6 = vpop.eup %1511 }
 0x4b8   :  { %v937_v8 = vmul.f32 %v1512_v6, %v932_v5 }
 0x4ba   :  { %v946_v9 = vadd.f32 %v1262_v7, %v937_v8 }
 0x4bb   :  { %v1514_v12 = vpop.eup %1513 }
 0x4bc   :  { %1434 = vmatprep.mubr.msk.f32.mxu1 %vm73_vm0, %v946_v9  ;;  %v939_v13 = vmul.f32 %v1514_v12, %v933_v11 }
 0x4be   :  { %v947_v14 = vadd.f32 %v1262_v7, %v939_v13 }
 0x4c0   :  { %1435 = vmatmul.mubr.msk.f32.vlgmr.msra.gmra.mxu1 %vm73_vm0, %v947_v14 }
 0x580   :  { %v1436_v21 = vpop.f32.mrf.mxu1 }
 0x581   :  { %v1037_v22 = vadd.f32 %v1436_v21, %v1263_v20 }
 0x582   :  { %v1031_v23 = vpop.f32.mrf.mxu1 }
 0x583   :  { %v1032_v24 = vadd.f32 %v1263_v20, %v1031_v23  ;;  %v1041_v26 = vmax.f32 %v1037_v22, 0.0 }
 0x585   :  { %v1040_v25 = vmax.f32 %v1032_v24, 0.0 }
 0x587   :  { %1469 = vmatprep.mubr.f32.mxu0 %v1040_v25 }
 0x588   :  { %1470 = vmatmul.mubr.f32.vlgmr.msra.gmra.mxu0 %v1041_v26 }
 0x648   :  { %v1471_v28 = vpop.f32.mrf.mxu0 }
 0x649   :  { %v1137_v29 = vadd.f32 %v1471_v28, %v1266_v27 }
 0x64a   :  { %v1131_v30 = vpop.f32.mrf.mxu0 }
 0x64b   :  { %v1132_v31 = vadd.f32 %v1266_v27, %v1131_v30  ;;  %v1141_v16 = vadd.f32 %v1137_v29, %v947_v14 }
 0x64d   :  { %v1147_v32 = vsel %vm73_vm0, %v1141_v16, 0.0  ;;  %v1140_v10 = vadd.f32 %v1132_v31, %v946_v9 }
 0x64e   :  { %1148 = vadd.xlane.f32.xlu0 %v1147_v32 }
 0x64f   :  { %v1144_v33 = vsel %vm73_vm0, %v1140_v10, 0.0 }
 0x650   :  { %1145 = vadd.xlane.f32.xlu1 %v1144_v33 }
 0x6d7   :  { %v1149_v34 = vpop.xlane.xlu0 %1148 }
 0x6d8   :  { %v1151_v35 = vmul.f32 0.03125, %v1149_v34 }
 0x6d9   :  { %v1146_v36 = vpop.xlane.xlu1 %1145 }
 0x6da   :  { %v1153_v37 = vsub.f32 %v1141_v16, %v1151_v35  ;;  %v1150_v38 = vmul.f32 0.03125, %v1146_v36 }
 0x6dc   :  { %v1152_v39 = vsub.f32 %v1140_v10, %v1150_v38  ;;  %v1155_v40 = vmul.f32 %v1153_v37, %v1153_v37  ;;  %v1187_v1 = vmul.f32 %v1267_v0, %v1153_v37 }
 0x6de   :  { %v1159_v41 = vsel %vm73_vm0, %v1155_v40, 0.0  ;;  %v1154_v42 = vmul.f32 %v1152_v39, %v1152_v39  ;;  %v1186_v5 = vmul.f32 %v1267_v0, %v1152_v39 }
 0x6df   :  { %1160 = vadd.xlane.f32.xlu0 %v1159_v41 }
 0x6e0   :  { %v1156_v43 = vsel %vm73_vm0, %v1154_v42, 0.0 }
 0x6e1   :  { %1157 = vadd.xlane.f32.xlu1 %v1156_v43 }
 0x6f2   :  { %1204 = vperm.xlu1 %1486, %v67_v44  }
 0x6f5   :  { %1209 = vperm.xlu0 %1485, %v68_v45  }
 0x768   :  { %v1161_v46 = vpop.xlane.xlu0 %1160 }
 0x769   :  { %v1163_v47 = vmul.f32 0.032258064, %v1161_v46 }
 0x76a   :  { %v1158_v48 = vpop.xlane.xlu1 %1157 }
 0x76b   :  { %v1165_v49 = vadd.f32 1e-06, %v1163_v47  ;;  %v1162_v50 = vmul.f32 0.032258064, %v1158_v48 }
 0x76d   :  { %1515 = vrsqrt.f32 %v1165_v49  ;;  %v1164_v51 = vadd.f32 1e-06, %v1162_v50  ;;  %vm1175_vm9 = vcmp.eq.f32.partialorder %v1165_v49, inf  ;;  %v1178_v54 = vand.u32 2147483648, %v1165_v49 }
 0x76e   :  { %vm1177_vm10 = vcmp.eq.f32.partialorder %v1165_v49, 0.0  ;;  %v1205_v13 = vpop.permute.xlu1 %1204 }
 0x76f   :  { %1517 = vrsqrt.f32 %v1164_v51  ;;  %vm1168_vm11 = vcmp.eq.f32.partialorder %v1164_v51, inf  ;;  %v1171_v59 = vand.u32 2147483648, %v1164_v51  ;;  %vm1170_vm12 = vcmp.eq.f32.partialorder %v1164_v51, 0.0 }
 0x770   :  { %v1210_v9 = vpop.permute.xlu0 %1209 }
 0x77a   :  { %v1516_v52 = vpop.eup %1515 }
 0x77b   :  { %v1174_v53 = vmul.f32 %v1516_v52, %v1165_v49 }
 0x77c   :  { %v1518_v55 = vpop.eup %1517 }
 0x77d   :  { %v1176_v56 = vsel %vm1175_vm9, %v1165_v49, %v1174_v53  ;;  %v1167_v57 = vmul.f32 %v1518_v55, %v1164_v51 }
 0x77e   :  { %v1179_v58 = vsel %vm1177_vm10, %v1178_v54, %v1176_v56 }
 0x77f   :  { %v1189_v60 = vadd.f32 1e-06, %v1179_v58  ;;  %v1169_v61 = vsel %vm1168_vm11, %v1164_v51, %v1167_v57 }
 0x780   :  { %v1172_v62 = vsel %vm1170_vm12, %v1171_v59, %v1169_v61 }
 0x781   :  { %1519 = vrcp.f32 %v1189_v60  ;;  %v1188_v63 = vadd.f32 1e-06, %v1172_v62 }
 0x783   :  { %1521 = vrcp.f32 %v1188_v63 }
 0x78e   :  { %v1520_v2 = vpop.eup %1519 }
 0x78f   :  { %v1193_v4 = vmul.f32 %v1520_v2, %v1187_v1 }
 0x790   :  { %v1522_v6 = vpop.eup %1521 }
 0x791   :  { %v1201_v7 = vadd.f32 %v1268_v3, %v1193_v4  ;;  %v1191_v8 = vmul.f32 %v1522_v6, %v1186_v5 }
 0x793   :  { %v1213_v11 = vmul.f32 %v1210_v9, %v1201_v7  ;;  %v1200_v12 = vadd.f32 %v1268_v3, %v1191_v8 }
 0x795   :  { %1215 = vst.msk [vmem:[#allocation2 + $0x8] sm:$0xff] %vm73_vm0, %v1213_v11  ;;  %v1212_v14 = vmul.f32 %v1205_v13, %v1200_v12 }
 0x797   :  { %1214 = vst.msk [vmem:[#allocation2] sm:$0xff] %vm73_vm0, %v1212_v14 }
 0x798   :  { %1534 = shalt.err (!%p1531_p4)
}
 0x799   :  { %s1548_s16 = smov 128   ;;  %s1549_s22 = smov 8  }
 0x79a   :  { %1227 = dma.vmem_to_hbm [thread:$0]  %s1222_s27, 256, %s1970_s17, [#allocation3], %s1548_s16, %s1548_s16, %s1549_s22  }
 0x79b   :  { %1543 = dma.done.wait [#allocation3], 256  }
 0x79c   :  { %1544 = vsyncadd [#allocation3], 4294967040 }
 0x79d   :  { %1231 = vsyncpa [#allocation3], 1 }

</bundles_post_ra>
